<compile_context>
chip_gen: v6e
topology: v6e:2x2x1
jax: 0.10.0
libtpu: 0.0.40
codegen_flags: <defaults>
</compile_context>

<pallas_src>
import jax
import jax.numpy as jnp
from jax import lax
from jax.experimental import pallas as pl
from jax.experimental.pallas import tpu as pltpu

EPS = 1e-5
NEG_SLOPE = 0.2
KH = KW = 4
STRIDE = 2
PAD = 1

LANE = 128            # pad K and Cout to multiples of the lane width
SUBLANE = 8
MAX_TILE_M = 1024     # 512-1024 rows fits v7x's 64 MiB VMEM; v5e/v6e could go 2-4x larger
VMEM_LIMIT = 48 * 1024 * 1024


def _round_up(x, m):
    return (x + m - 1) // m * m


def conv_stats_kernel(p_ref, w_ref, y_ref, sum_ref, sq_ref):
    """Per M-tile: bf16 MXU matmul (f32 acc) + single-pass BN stat accumulation."""
    @pl.when(pl.program_id(0) == 0)
    def _():
        sum_ref[...] = jnp.zeros_like(sum_ref)
        sq_ref[...] = jnp.zeros_like(sq_ref)

    y = jnp.dot(p_ref[...], w_ref[...], preferred_element_type=jnp.float32)
    y_ref[...] = y
    sum_ref[...] += jnp.sum(y, axis=0, keepdims=True)
    sq_ref[...] += jnp.sum(y * y, axis=0, keepdims=True)


def bn_lrelu_kernel(y_ref, scale_ref, shift_ref, o_ref):
    """Per M-tile: fused BN affine + LeakyReLU(0.2)."""
    z = y_ref[...] * scale_ref[...] + shift_ref[...]
    o_ref[...] = jnp.where(z >= 0.0, z, NEG_SLOPE * z)


@jax.jit
def conv_layer(x, weight, bias, gamma, beta):
    del bias  # exactly cancelled by training-mode BatchNorm's mean subtraction
    n, cin, h, w = x.shape
    cout = weight.shape[0]
    ho = (h + 2 * PAD - KH) // STRIDE + 1
    wo = (w + 2 * PAD - KW) // STRIDE + 1
    m = n * ho * wo
    k = cin * KH * KW

    # im2col: XLA-fused patch extraction, already in NHWC patch layout.
    # Feature order is (cin, kh, kw)-major -> matches weight.reshape(cout, -1).
    patches = lax.conv_general_dilated_patches(
        x, (KH, KW), (STRIDE, STRIDE),
        padding=((PAD, PAD), (PAD, PAD)),
        dimension_numbers=("NCHW", "OIHW", "NHWC"),
    ).reshape(m, k)

    k_pad = _round_up(k, LANE)
    c_pad = _round_up(cout, LANE)
    tm = min(MAX_TILE_M, _round_up(m, SUBLANE))
    m_pad = _round_up(m, tm)

    patches_p = jnp.pad(patches.astype(jnp.bfloat16),
                        ((0, m_pad - m), (0, k_pad - k)))
    wmat_p = jnp.pad(weight.reshape(cout, k).T.astype(jnp.bfloat16),
                     ((0, k_pad - k), (0, c_pad - cout)))

    # ---- Pass 1: conv matmul + per-channel sum / sumsq accumulation. ----
    y_full, csum, csq = pl.pallas_call(
        conv_stats_kernel,
        out_shape=(
            jax.ShapeDtypeStruct((m_pad, c_pad), jnp.float32),
            jax.ShapeDtypeStruct((1, c_pad), jnp.float32),
            jax.ShapeDtypeStruct((1, c_pad), jnp.float32),
        ),
        grid_spec=pltpu.PrefetchScalarGridSpec(
            num_scalar_prefetch=0,
            grid=(m_pad // tm,),
            in_specs=[
                pl.BlockSpec((tm, k_pad), lambda i: (i, 0)),
                pl.BlockSpec((k_pad, c_pad), lambda i: (0, 0)),
            ],
            out_specs=[
                pl.BlockSpec((tm, c_pad), lambda i: (i, 0)),
                pl.BlockSpec((1, c_pad), lambda i: (0, 0)),
                pl.BlockSpec((1, c_pad), lambda i: (0, 0)),
            ],
        ),
        compiler_params=pltpu.CompilerParams(
            dimension_semantics=("arbitrary",),
            vmem_limit_bytes=VMEM_LIMIT),
    )(patches_p, wmat_p)

    # ---- Host-side finalize: c_pad floats of work, negligible. ----
    mean = csum[0] / m
    var = jnp.maximum(csq[0] / m - mean * mean, 0.0)   # biased variance
    inv = lax.rsqrt(var + EPS)
    gamma_p = jnp.pad(gamma.astype(jnp.float32), (0, c_pad - cout))
    beta_p = jnp.pad(beta.astype(jnp.float32), (0, c_pad - cout))
    scale = (gamma_p * inv).reshape(1, c_pad)
    shift = (beta_p - mean * gamma_p * inv).reshape(1, c_pad)

    # ---- Pass 2: normalize + LeakyReLU (lane-dense, parallel over M tiles). ----
    out_full = pl.pallas_call(
        bn_lrelu_kernel,
        out_shape=jax.ShapeDtypeStruct((m_pad, c_pad), jnp.float32),
        grid_spec=pltpu.PrefetchScalarGridSpec(
            num_scalar_prefetch=0,
            grid=(m_pad // tm,),
            in_specs=[
                pl.BlockSpec((tm, c_pad), lambda i: (i, 0)),
                pl.BlockSpec((1, c_pad), lambda i: (0, 0)),
                pl.BlockSpec((1, c_pad), lambda i: (0, 0)),
            ],
            out_specs=pl.BlockSpec((tm, c_pad), lambda i: (i, 0)),
        ),
        compiler_params=pltpu.CompilerParams(
            dimension_semantics=("parallel",),
            vmem_limit_bytes=VMEM_LIMIT),
    )(y_full, scale, shift)

    # (M, C) -> NCHW (module spec requires NCHW).
    # TODO(synk): skip this transpose if the downstream consumer accepts NHWC.
    out = out_full[:m, :cout].reshape(n, ho, wo, cout)
    return out.transpose(0, 3, 1, 2)


if __name__ == "__main__":
    key = jax.random.PRNGKey(0)
    k1, k2, k3, k4, k5 = jax.random.split(key, 5)

    N, Cin, H, W = 2, 4, 16, 16
    Cout = 8

    x = jax.random.normal(k1, (N, Cin, H, W), jnp.float32)
    weight = 0.1 * jax.random.normal(k2, (Cout, Cin, KH, KW), jnp.float32)
    bias = 0.1 * jax.random.normal(k3, (Cout,), jnp.float32)
    gamma = 1.0 + 0.1 * jax.random.normal(k4, (Cout,), jnp.float32)
    beta = 0.1 * jax.random.normal(k5, (Cout,), jnp.float32)

    out = jax.block_until_ready(conv_layer(x, weight, bias, gamma, beta))

    # Pure-JAX f32 reference (PyTorch semantics: conv+bias -> training-mode BN
    # -> LeakyReLU; the bias cancels under BN, so dropping it in the kernel is
    # mathematically exact).
    y = lax.conv_general_dilated(
        x, weight, window_strides=(STRIDE, STRIDE),
        padding=((PAD, PAD), (PAD, PAD)),
        dimension_numbers=("NCHW", "OIHW", "NCHW")) + bias[None, :, None, None]
    mean = y.mean(axis=(0, 2, 3), keepdims=True)
    var = y.var(axis=(0, 2, 3), keepdims=True)   # biased, as in BN forward
    z = gamma[None, :, None, None] * (y - mean) / jnp.sqrt(var + EPS) \
        + beta[None, :, None, None]
    ref = jnp.where(z >= 0.0, z, NEG_SLOPE * z)

    assert out.shape == ref.shape == (N, Cout, H // 2, W // 2)
    err = float(jnp.max(jnp.abs(out - ref)))
    # bf16 MXU inputs -> loosened tolerance vs the f32 reference.
    assert err < 3e-2, err
    print("KERNEL_OK")
</pallas_src>

<mosaic_0001>
module attributes {stable_mosaic.version = 11 : i64} {
  func.func @conv_stats_kernel(%arg0: i32, %arg1: memref<128x128xbf16, #tpu.memory_space<vmem>>, %arg2: memref<128x128xbf16, #tpu.memory_space<vmem>>, %arg3: memref<128x128xf32, #tpu.memory_space<vmem>>, %arg4: memref<1x128xf32, #tpu.memory_space<vmem>>, %arg5: memref<1x128xf32, #tpu.memory_space<vmem>>) attributes {dimension_semantics = [#tpu.dimension_semantics<arbitrary>], iteration_bounds = array<i64: 1>, scalar_prefetch = 0 : i64, scratch_operands = 0 : i64, tpu.core_type = #tpu.core_type<tc>, window_params = [{transform_indices = @transform_0, window_bounds = array<i64: 128, 128>}, {pipeline_mode = #tpu.pipeline_mode<synchronous>, transform_indices = @transform_1, window_bounds = array<i64: 128, 128>}, {transform_indices = @transform_2, window_bounds = array<i64: 128, 128>}, {pipeline_mode = #tpu.pipeline_mode<synchronous>, transform_indices = @transform_3, window_bounds = array<i64: 1, 128>}, {pipeline_mode = #tpu.pipeline_mode<synchronous>, transform_indices = @transform_4, window_bounds = array<i64: 1, 128>}]} {
    %c0_i32 = arith.constant 0 : i32
    %0 = arith.cmpi eq, %arg0, %c0_i32 : i32
    %1 = arith.extui %0 : i1 to i32
    %c0_i32_0 = arith.constant 0 : i32
    %2 = arith.cmpi ne, %1, %c0_i32_0 : i32
    scf.if %2 {
      %cst_16 = arith.constant 0.000000e+00 : f32
      %18 = vector.broadcast %cst_16 : f32 to vector<1x128xf32>
      %c0_17 = arith.constant 0 : index
      %c0_18 = arith.constant 0 : index
      %19 = vector.load %arg4[%c0_17, %c0_18] : memref<1x128xf32, #tpu.memory_space<vmem>>, vector<1x128xf32>
      tpu.vector_store %arg4[%c0_17, %c0_18], %18 {strides = array<i32>} : memref<1x128xf32, #tpu.memory_space<vmem>>, vector<1x128xf32>,
      %cst_19 = arith.constant 0.000000e+00 : f32
      %20 = vector.broadcast %cst_19 : f32 to vector<1x128xf32>
      %c0_20 = arith.constant 0 : index
      %c0_21 = arith.constant 0 : index
      %21 = vector.load %arg5[%c0_20, %c0_21] : memref<1x128xf32, #tpu.memory_space<vmem>>, vector<1x128xf32>
      tpu.vector_store %arg5[%c0_20, %c0_21], %20 {strides = array<i32>} : memref<1x128xf32, #tpu.memory_space<vmem>>, vector<1x128xf32>,
    } else {
    }
    %c0 = arith.constant 0 : index
    %c0_1 = arith.constant 0 : index
    %3 = vector.load %arg1[%c0, %c0_1] : memref<128x128xbf16, #tpu.memory_space<vmem>>, vector<128x128xbf16>
    %c0_2 = arith.constant 0 : index
    %c0_3 = arith.constant 0 : index
    %4 = vector.load %arg2[%c0_2, %c0_3] : memref<128x128xbf16, #tpu.memory_space<vmem>>, vector<128x128xbf16>
    %cst = arith.constant dense<0.000000e+00> : vector<128x128xf32>
    %5 = tpu.matmul %3, %4, %cst {dimension_numbers = #tpu.dot_dimension_numbers<[1], [0], [0], [1], [0, 0, 1, 1], [], []>} : vector<128x128xbf16>, vector<128x128xbf16>, vector<128x128xf32> -> vector<128x128xf32>
    %c0_4 = arith.constant 0 : index
    %c0_5 = arith.constant 0 : index
    %6 = vector.load %arg3[%c0_4, %c0_5] : memref<128x128xf32, #tpu.memory_space<vmem>>, vector<128x128xf32>
    tpu.vector_store %arg3[%c0_4, %c0_5], %5 {strides = array<i32>} : memref<128x128xf32, #tpu.memory_space<vmem>>, vector<128x128xf32>,
    %c0_6 = arith.constant 0 : index
    %c0_7 = arith.constant 0 : index
    %7 = vector.load %arg4[%c0_6, %c0_7] : memref<1x128xf32, #tpu.memory_space<vmem>>, vector<1x128xf32>
    %cst_8 = arith.constant dense<0.000000e+00> : vector<128xf32>
    %8 = vector.multi_reduction <add>, %5, %cst_8 [0] : vector<128x128xf32> to vector<128xf32>
    %9 = vector.shape_cast %8 : vector<128xf32> to vector<1x128xf32>
    %10 = arith.addf %7, %9 : vector<1x128xf32>
    %c0_9 = arith.constant 0 : index
    %c0_10 = arith.constant 0 : index
    %11 = vector.load %arg4[%c0_9, %c0_10] : memref<1x128xf32, #tpu.memory_space<vmem>>, vector<1x128xf32>
    tpu.vector_store %arg4[%c0_9, %c0_10], %10 {strides = array<i32>} : memref<1x128xf32, #tpu.memory_space<vmem>>, vector<1x128xf32>,
    %c0_11 = arith.constant 0 : index
    %c0_12 = arith.constant 0 : index
    %12 = vector.load %arg5[%c0_11, %c0_12] : memref<1x128xf32, #tpu.memory_space<vmem>>, vector<1x128xf32>
    %13 = arith.mulf %5, %5 : vector<128x128xf32>
    %cst_13 = arith.constant dense<0.000000e+00> : vector<128xf32>
    %14 = vector.multi_reduction <add>, %13, %cst_13 [0] : vector<128x128xf32> to vector<128xf32>
    %15 = vector.shape_cast %14 : vector<128xf32> to vector<1x128xf32>
    %16 = arith.addf %12, %15 : vector<1x128xf32>
    %c0_14 = arith.constant 0 : index
    %c0_15 = arith.constant 0 : index
    %17 = vector.load %arg5[%c0_14, %c0_15] : memref<1x128xf32, #tpu.memory_space<vmem>>, vector<1x128xf32>
    tpu.vector_store %arg5[%c0_14, %c0_15], %16 {strides = array<i32>} : memref<1x128xf32, #tpu.memory_space<vmem>>, vector<1x128xf32>,
    return
  }
  func.func @transform_0(%arg0: i32) -> (i32, i32) {
    %c0_i32 = arith.constant 0 : i32
    %c0_i32_0 = arith.constant 0 : i32
    return %arg0, %c0_i32 : i32, i32
  }
  func.func @transform_1(%arg0: i32) -> (i32, i32) {
    %c0_i32 = arith.constant 0 : i32
    %c0_i32_0 = arith.constant 0 : i32
    %c0_i32_1 = arith.constant 0 : i32
    return %c0_i32, %c0_i32_0 : i32, i32
  }
  func.func @transform_2(%arg0: i32) -> (i32, i32) {
    %c0_i32 = arith.constant 0 : i32
    %c0_i32_0 = arith.constant 0 : i32
    return %arg0, %c0_i32 : i32, i32
  }
  func.func @transform_3(%arg0: i32) -> (i32, i32) {
    %c0_i32 = arith.constant 0 : i32
    %c0_i32_0 = arith.constant 0 : i32
    %c0_i32_1 = arith.constant 0 : i32
    return %c0_i32, %c0_i32_0 : i32, i32
  }
  func.func @transform_4(%arg0: i32) -> (i32, i32) {
    %c0_i32 = arith.constant 0 : i32
    %c0_i32_0 = arith.constant 0 : i32
    %c0_i32_1 = arith.constant 0 : i32
    return %c0_i32, %c0_i32_0 : i32, i32
  }
}

module attributes {stable_mosaic.version = 11 : i64} {
  func.func @bn_lrelu_kernel(%arg0: i32, %arg1: memref<128x128xf32, #tpu.memory_space<vmem>>, %arg2: memref<1x128xf32, #tpu.memory_space<vmem>>, %arg3: memref<1x128xf32, #tpu.memory_space<vmem>>, %arg4: memref<128x128xf32, #tpu.memory_space<vmem>>) attributes {dimension_semantics = [#tpu.dimension_semantics<parallel>], iteration_bounds = array<i64: 1>, scalar_prefetch = 0 : i64, scratch_operands = 0 : i64, tpu.core_type = #tpu.core_type<tc>, window_params = [{transform_indices = @transform_0, window_bounds = array<i64: 128, 128>}, {pipeline_mode = #tpu.pipeline_mode<synchronous>, transform_indices = @transform_1, window_bounds = array<i64: 1, 128>}, {pipeline_mode = #tpu.pipeline_mode<synchronous>, transform_indices = @transform_2, window_bounds = array<i64: 1, 128>}, {transform_indices = @transform_3, window_bounds = array<i64: 128, 128>}]} {
    %c0 = arith.constant 0 : index
    %c0_0 = arith.constant 0 : index
    %0 = vector.load %arg1[%c0, %c0_0] : memref<128x128xf32, #tpu.memory_space<vmem>>, vector<128x128xf32>
    %c0_1 = arith.constant 0 : index
    %c0_2 = arith.constant 0 : index
    %1 = vector.load %arg2[%c0_1, %c0_2] : memref<1x128xf32, #tpu.memory_space<vmem>>, vector<1x128xf32>
    %2 = vector.broadcast %1 : vector<1x128xf32> to vector<128x128xf32>
    %3 = arith.mulf %0, %2 : vector<128x128xf32>
    %c0_3 = arith.constant 0 : index
    %c0_4 = arith.constant 0 : index
    %4 = vector.load %arg3[%c0_3, %c0_4] : memref<1x128xf32, #tpu.memory_space<vmem>>, vector<1x128xf32>
    %5 = vector.broadcast %4 : vector<1x128xf32> to vector<128x128xf32>
    %6 = arith.addf %3, %5 : vector<128x128xf32>
    %cst = arith.constant 0.000000e+00 : f32
    %7 = vector.broadcast %cst : f32 to vector<128x128xf32>
    %8 = arith.cmpf oge, %6, %7 : vector<128x128xf32>
    %cst_5 = arith.constant 2.000000e-01 : f32
    %9 = vector.broadcast %cst_5 : f32 to vector<128x128xf32>
    %10 = arith.mulf %9, %6 : vector<128x128xf32>
    %11 = arith.select %8, %6, %10 : vector<128x128xi1>, vector<128x128xf32>
    %c0_6 = arith.constant 0 : index
    %c0_7 = arith.constant 0 : index
    %12 = vector.load %arg4[%c0_6, %c0_7] : memref<128x128xf32, #tpu.memory_space<vmem>>, vector<128x128xf32>
    tpu.vector_store %arg4[%c0_6, %c0_7], %11 {strides = array<i32>} : memref<128x128xf32, #tpu.memory_space<vmem>>, vector<128x128xf32>,
    return
  }
  func.func @transform_0(%arg0: i32) -> (i32, i32) {
    %c0_i32 = arith.constant 0 : i32
    %c0_i32_0 = arith.constant 0 : i32
    return %arg0, %c0_i32 : i32, i32
  }
  func.func @transform_1(%arg0: i32) -> (i32, i32) {
    %c0_i32 = arith.constant 0 : i32
    %c0_i32_0 = arith.constant 0 : i32
    %c0_i32_1 = arith.constant 0 : i32
    return %c0_i32, %c0_i32_0 : i32, i32
  }
  func.func @transform_2(%arg0: i32) -> (i32, i32) {
    %c0_i32 = arith.constant 0 : i32
    %c0_i32_0 = arith.constant 0 : i32
    %c0_i32_1 = arith.constant 0 : i32
    return %c0_i32, %c0_i32_0 : i32, i32
  }
  func.func @transform_3(%arg0: i32) -> (i32, i32) {
    %c0_i32 = arith.constant 0 : i32
    %c0_i32_0 = arith.constant 0 : i32
    return %arg0, %c0_i32 : i32, i32
  }
}

</mosaic_0001>

<bundles_post_ra>
// kernel: conv_layer.3
= control target key start
LH: loop header
LB: loop body
LE: loop exit
PB: predicated region body
PF: predicated region fallthrough
CT: control target
= control target key end

     0   :  { %s305_s0 = inlined_call_operand.vmem [shape: f32[128,128], index: 0, kind: input, shape index: {}]   ;;  %s306_s1 = inlined_call_operand.vmem [shape: f32[1,128], index: 1, kind: input, shape index: {}]   ;;  %s307_s2 = inlined_call_operand.vmem [shape: f32[1,128], index: 2, kind: input, shape index: {}]   ;;  %s308_s3 = inlined_call_operand.vmem [shape: f32[128,128], index: 3, kind: output, shape index: {}]  }
   0x1   :  { %v14_v0 = vld [vmem:[%s305_s0] sm:$0xff]  ;;  %v15_v4 = vld [vmem:[%s305_s0 + $0x8] sm:$0xff]  ;;  %v16_v5 = vld [vmem:[%s305_s0 + $0x10] sm:$0xff] }
   0x2   :  { %v172_v1 = vld [vmem:[%s306_s1] ss:$0 sm:$0xff]  ;;  %v17_v6 = vld [vmem:[%s305_s0 + $0x18] sm:$0xff]  ;;  %v19_v11 = vld [vmem:[%s305_s0 + $0x28] sm:$0xff] }
   0x3   :  { %v177_v2 = vld [vmem:[%s307_s2] ss:$0 sm:$0xff]  ;;  %v37_v3 = vmul.f32 %v172_v1, %v14_v0  ;;  %v38_v7 = vmul.f32 %v172_v1, %v15_v4  ;;  %v39_v8 = vmul.f32 %v172_v1, %v16_v5  ;;  %v40_v9 = vmul.f32 %v172_v1, %v17_v6  ;;  %v20_v12 = vld [vmem:[%s305_s0 + $0x30] sm:$0xff]  ;;  %v21_v17 = vld [vmem:[%s305_s0 + $0x38] sm:$0xff] }
   0x4   :  { %v18_v10 = vld [vmem:[%s305_s0 + $0x20] sm:$0xff]  ;;  %v42_v15 = vmul.f32 %v172_v1, %v19_v11  ;;  %v43_v16 = vmul.f32 %v172_v1, %v20_v12  ;;  %v44_v21 = vmul.f32 %v172_v1, %v21_v17  ;;  %v23_v30 = vld [vmem:[%s305_s0 + $0x48] sm:$0xff]  ;;  %v24_v31 = vld [vmem:[%s305_s0 + $0x50] sm:$0xff] }
   0x5   :  { %v60_v13 = vadd.f32 %v177_v2, %v37_v3  ;;  %v41_v14 = vmul.f32 %v172_v1, %v18_v10  ;;  %v61_v18 = vadd.f32 %v177_v2, %v38_v7  ;;  %v62_v19 = vadd.f32 %v177_v2, %v39_v8  ;;  %v22_v25 = vld [vmem:[%s305_s0 + $0x40] sm:$0xff]  ;;  %v25_v43 = vld [vmem:[%s305_s0 + $0x58] sm:$0xff]  ;;  %v27_v45 = vld [vmem:[%s305_s0 + $0x68] sm:$0xff] }
   0x6   :  { %v63_v20 = vadd.f32 %v177_v2, %v40_v9  ;;  %v65_v24 = vadd.f32 %v177_v2, %v42_v15  ;;  %v66_v37 = vadd.f32 %v177_v2, %v43_v16  ;;  %v67_v38 = vadd.f32 %v177_v2, %v44_v21  ;;  %v26_v44 = vld [vmem:[%s305_s0 + $0x60] sm:$0xff]  ;;  %v28_v56 = vld [vmem:[%s305_s0 + $0x70] sm:$0xff]  ;;  %v29_v4 = vld [vmem:[%s305_s0 + $0x78] sm:$0xff] }
   0x7   :  { %vm76_vm0 = vcmp.ge.f32.partialorder %v60_v13, 0.0  ;;  %v92_v22 = vmul.f32 0.2, %v60_v13  ;;  %v64_v23 = vadd.f32 %v177_v2, %v41_v14  ;;  %vm77_vm1 = vcmp.ge.f32.partialorder %v61_v18, 0.0 }
   0x8   :  { %v93_v26 = vmul.f32 0.2, %v61_v18  ;;  %vm78_vm2 = vcmp.ge.f32.partialorder %v62_v19, 0.0  ;;  %v94_v27 = vmul.f32 0.2, %v62_v19  ;;  %vm79_vm3 = vcmp.ge.f32.partialorder %v63_v20, 0.0 }
   0x9   :  { %v108_v28 = vsel %vm76_vm0, %v60_v13, %v92_v22  ;;  %v95_v29 = vmul.f32 0.2, %v63_v20  ;;  %vm80_vm4 = vcmp.ge.f32.partialorder %v64_v23, 0.0  ;;  %v96_v34 = vmul.f32 0.2, %v64_v23 }
   0xa   :  { %124 = vst [vmem:[%s308_s3] sm:$0xff] %v108_v28  ;;  %v109_v32 = vsel %vm77_vm1, %v61_v18, %v93_v26  ;;  %v110_v33 = vsel %vm78_vm2, %v62_v19, %v94_v27  ;;  %vm81_vm5 = vcmp.ge.f32.partialorder %v65_v24, 0.0  ;;  %v97_v36 = vmul.f32 0.2, %v65_v24 }
   0xb   :  { %125 = vst [vmem:[%s308_s3 + $0x8] sm:$0xff] %v109_v32  ;;  %126 = vst [vmem:[%s308_s3 + $0x10] sm:$0xff] %v110_v33  ;;  %v111_v35 = vsel %vm79_vm3, %v63_v20, %v95_v29  ;;  %v112_v39 = vsel %vm80_vm4, %v64_v23, %v96_v34  ;;  %v45_v40 = vmul.f32 %v172_v1, %v22_v25  ;;  %vm82_vm6 = vcmp.ge.f32.partialorder %v66_v37, 0.0 }
   0xc   :  { %127 = vst [vmem:[%s308_s3 + $0x18] sm:$0xff] %v111_v35  ;;  %v46_v41 = vmul.f32 %v172_v1, %v23_v30  ;;  %v47_v42 = vmul.f32 %v172_v1, %v24_v31  ;;  %128 = vst [vmem:[%s308_s3 + $0x20] sm:$0xff] %v112_v39  ;;  %v113_v46 = vsel %vm81_vm5, %v65_v24, %v97_v36  ;;  %v98_v47 = vmul.f32 0.2, %v66_v37 }
   0xd   :  { %vm83_vm7 = vcmp.ge.f32.partialorder %v67_v38, 0.0  ;;  %129 = vst [vmem:[%s308_s3 + $0x28] sm:$0xff] %v113_v46  ;;  %v99_v48 = vmul.f32 0.2, %v67_v38  ;;  %v68_v49 = vadd.f32 %v177_v2, %v45_v40  ;;  %v48_v53 = vmul.f32 %v172_v1, %v25_v43 }
   0xe   :  { %v69_v50 = vadd.f32 %v177_v2, %v46_v41  ;;  %v70_v51 = vadd.f32 %v177_v2, %v47_v42  ;;  %v114_v52 = vsel %vm82_vm6, %v66_v37, %v98_v47  ;;  %v49_v54 = vmul.f32 %v172_v1, %v26_v44 }
   0xf   :  { %v50_v55 = vmul.f32 %v172_v1, %v27_v45  ;;  %130 = vst [vmem:[%s308_s3 + $0x30] sm:$0xff] %v114_v52  ;;  %v115_v57 = vsel %vm83_vm7, %v67_v38, %v99_v48  ;;  %vm84_vm8 = vcmp.ge.f32.partialorder %v68_v49, 0.0  ;;  %v100_v58 = vmul.f32 0.2, %v68_v49 }
  0x10   :  { %vm85_vm9 = vcmp.ge.f32.partialorder %v69_v50, 0.0  ;;  %131 = vst [vmem:[%s308_s3 + $0x38] sm:$0xff] %v115_v57  ;;  %v101_v59 = vmul.f32 0.2, %v69_v50  ;;  %vm86_vm10 = vcmp.ge.f32.partialorder %v70_v51, 0.0  ;;  %v71_v61 = vadd.f32 %v177_v2, %v48_v53 }
  0x11   :  { %v102_v60 = vmul.f32 0.2, %v70_v51  ;;  %v116_v62 = vsel %vm84_vm8, %v68_v49, %v100_v58  ;;  %v72_v63 = vadd.f32 %v177_v2, %v49_v54  ;;  %v73_v0 = vadd.f32 %v177_v2, %v50_v55 }
  0x12   :  { %v51_v3 = vmul.f32 %v172_v1, %v28_v56  ;;  %132 = vst [vmem:[%s308_s3 + $0x40] sm:$0xff] %v116_v62  ;;  %v117_v5 = vsel %vm85_vm9, %v69_v50, %v101_v59  ;;  %vm87_vm11 = vcmp.ge.f32.partialorder %v71_v61, 0.0  ;;  %v103_v7 = vmul.f32 0.2, %v71_v61 }
  0x13   :  { %v118_v6 = vsel %vm86_vm10, %v70_v51, %v102_v60  ;;  %133 = vst [vmem:[%s308_s3 + $0x48] sm:$0xff] %v117_v5  ;;  %vm88_vm12 = vcmp.ge.f32.partialorder %v72_v63, 0.0  ;;  %v104_v8 = vmul.f32 0.2, %v72_v63  ;;  %vm89_vm13 = vcmp.ge.f32.partialorder %v73_v0, 0.0 }
  0x14   :  { %134 = vst [vmem:[%s308_s3 + $0x50] sm:$0xff] %v118_v6  ;;  %v105_v9 = vmul.f32 0.2, %v73_v0  ;;  %v119_v10 = vsel %vm87_vm11, %v71_v61, %v103_v7  ;;  %v74_v11 = vadd.f32 %v177_v2, %v51_v3  ;;  %v52_v12 = vmul.f32 %v172_v1, %v29_v4 }
  0x15   :  { %135 = vst [vmem:[%s308_s3 + $0x58] sm:$0xff] %v119_v10  ;;  %v120_v13 = vsel %vm88_vm12, %v72_v63, %v104_v8 }
  0x16   :  { %v121_v14 = vsel %vm89_vm13, %v73_v0, %v105_v9  ;;  %136 = vst [vmem:[%s308_s3 + $0x60] sm:$0xff] %v120_v13  ;;  %vm90_vm14 = vcmp.ge.f32.partialorder %v74_v11, 0.0  ;;  %v106_v15 = vmul.f32 0.2, %v74_v11  ;;  %v75_v16 = vadd.f32 %v177_v2, %v52_v12 }
  0x17   :  { %137 = vst [vmem:[%s308_s3 + $0x68] sm:$0xff] %v121_v14 }
  0x18   :  { %v122_v17 = vsel %vm90_vm14, %v74_v11, %v106_v15  ;;  %vm91_vm15 = vcmp.ge.f32.partialorder %v75_v16, 0.0  ;;  %v107_v1 = vmul.f32 0.2, %v75_v16 }
  0x19   :  { %138 = vst [vmem:[%s308_s3 + $0x70] sm:$0xff] %v122_v17 }
  0x1a   :  { %v123_v18 = vsel %vm91_vm15, %v75_v16, %v107_v1 }
  0x1b   :  { %139 = vst [vmem:[%s308_s3 + $0x78] sm:$0xff] %v123_v18 }

// kernel: conv_layer.2
= control target key start
LH: loop header
LB: loop body
LE: loop exit
PB: predicated region body
PF: predicated region fallthrough
CT: control target
= control target key end

     0   :  { %v435_v16 = vmov 0.0   ;;  %s575_s1 = inlined_call_operand.vmem [shape: bf16[128,128], index: 1, kind: input, shape index: {}]   ;;  %s576_s0 = inlined_call_operand.vmem [shape: bf16[128,128], index: 0, kind: input, shape index: {}]   ;;  %s577_s3 = inlined_call_operand.vmem [shape: f32[1,128], index: 3, kind: output, shape index: {1}]   ;;  %s578_s4 = inlined_call_operand.vmem [shape: f32[1,128], index: 4, kind: output, shape index: {2}]   ;;  %s579_s2 = inlined_call_operand.vmem [shape: f32[128,128], index: 2, kind: output, shape index: {0}]  }
   0x1   :  { %v419_v0 = vld [vmem:[%s575_s1 + $0x38] sm:$0xff]   ;;  %v420_v1 = vld [vmem:[%s575_s1 + $0x30] sm:$0xff]   ;;  %v421_v2 = vld [vmem:[%s575_s1 + $0x28] sm:$0xff]   ;;  %19 = vst [vmem:[%s577_s3] sm:$0x1] %v435_v16 }
   0x2   :  { %370 = vmatprep.subr.bf16.mxu0 %v419_v0  ;;  %402 = vmatprep.subr.bf16.mxu1 %v419_v0  ;;  %v422_v3 = vld [vmem:[%s575_s1 + $0x20] sm:$0xff]   ;;  %v423_v5 = vld [vmem:[%s575_s1 + $0x18] sm:$0xff]   ;;  %v424_v7 = vld [vmem:[%s575_s1 + $0x10] sm:$0xff]   ;;  %20 = vst [vmem:[%s578_s4] sm:$0x1] %v435_v16 }
   0x3   :  { %371 = vmatpush3.bf16.msra.mxu0 %v419_v0  ;;  %410 = vmatpush3.bf16.msra.mxu1 %v419_v0  ;;  %v427_v4 = vld [vmem:[%s576_s0] sm:$0xff]   ;;  %v425_v8 = vld [vmem:[%s575_s1 + $0x8] sm:$0xff]   ;;  %v429_v12 = vld [vmem:[%s576_s0 + $0x10] sm:$0xff]  }
   0x4   :  { %372 = vmatprep.subr.bf16.mxu0 %v420_v1  ;;  %403 = vmatprep.subr.bf16.mxu1 %v420_v1  ;;  %v431_v6 = vld [vmem:[%s576_s0 + $0x20] sm:$0xff]   ;;  %v428_v10 = vld [vmem:[%s576_s0 + $0x8] sm:$0xff]   ;;  %v433_v13 = vld [vmem:[%s576_s0 + $0x30] sm:$0xff]  }
   0x5   :  { %386 = vmatprep.mubr.bf16.mxu0 %v427_v4  ;;  %394 = vmatprep.mubr.bf16.mxu1 %v431_v6  ;;  %v426_v9 = vld [vmem:[%s575_s1] sm:$0xff]   ;;  %v432_v11 = vld [vmem:[%s576_s0 + $0x28] sm:$0xff]   ;;  %v430_v14 = vld [vmem:[%s576_s0 + $0x18] sm:$0xff]  }
   0x6   :  { %v434_v15 = vld [vmem:[%s576_s0 + $0x38] sm:$0xff]  }
   0x7   :  { %373 = vmatpush3.bf16.msra.mxu0 %v420_v1  ;;  %411 = vmatpush3.bf16.msra.mxu1 %v420_v1 }
   0x8   :  { %374 = vmatprep.subr.bf16.mxu0 %v421_v2  ;;  %404 = vmatprep.subr.bf16.mxu1 %v421_v2 }
   0xb   :  { %375 = vmatpush3.bf16.msra.mxu0 %v421_v2  ;;  %412 = vmatpush3.bf16.msra.mxu1 %v421_v2 }
   0xc   :  { %376 = vmatprep.subr.bf16.mxu0 %v422_v3  ;;  %405 = vmatprep.subr.bf16.mxu1 %v422_v3 }
   0xf   :  { %377 = vmatpush3.bf16.msra.mxu0 %v422_v3  ;;  %413 = vmatpush3.bf16.msra.mxu1 %v422_v3 }
  0x10   :  { %378 = vmatprep.subr.bf16.mxu0 %v423_v5  ;;  %406 = vmatprep.subr.bf16.mxu1 %v423_v5 }
  0x13   :  { %379 = vmatpush3.bf16.msra.mxu0 %v423_v5  ;;  %414 = vmatpush3.bf16.msra.mxu1 %v423_v5 }
  0x14   :  { %380 = vmatprep.subr.bf16.mxu0 %v424_v7  ;;  %407 = vmatprep.subr.bf16.mxu1 %v424_v7 }
  0x17   :  { %381 = vmatpush3.bf16.msra.mxu0 %v424_v7  ;;  %415 = vmatpush3.bf16.msra.mxu1 %v424_v7 }
  0x18   :  { %382 = vmatprep.subr.bf16.mxu0 %v425_v8  ;;  %408 = vmatprep.subr.bf16.mxu1 %v425_v8 }
  0x1b   :  { %383 = vmatpush3.bf16.msra.mxu0 %v425_v8  ;;  %416 = vmatpush3.bf16.msra.mxu1 %v425_v8 }
  0x1c   :  { %384 = vmatprep.subr.bf16.mxu0 %v426_v9  ;;  %409 = vmatprep.subr.bf16.mxu1 %v426_v9 }
  0x1f   :  { %385 = vmatpush3.bf16.msra.mxu0 %v426_v9  ;;  %417 = vmatpush3.bf16.msra.mxu1 %v426_v9 }
  0x22   :  { %387 = vmatmul.mubr.bf16.vlgmr.msra.gmra.mxu0 %v428_v10  ;;  %395 = vmatmul.mubr.bf16.vlgmr.msra.gmra.mxu1 %v432_v11 }
  0x23   :  { %390 = vmatprep.mubr.bf16.mxu0 %v429_v12  ;;  %398 = vmatprep.mubr.bf16.mxu1 %v433_v13 }
  0x2a   :  { %391 = vmatmul.mubr.bf16.gmra.mxu0 %v430_v14  ;;  %399 = vmatmul.mubr.bf16.gmra.mxu1 %v434_v15 }
  0xe2   :  { %v388_v17 = vpop.f32.mrf.mxu0  ;;  %v396_v18 = vpop.f32.mrf.mxu1 }
  0xe3   :  { %248 = vst [vmem:[%s579_s2 + $0x10] sm:$0xff] %v388_v17  ;;  %256 = vst [vmem:[%s579_s2 + $0x50] sm:$0xff] %v396_v18  ;;  %v289_v30 = vmul.f32 %v388_v17, %v388_v17  ;;  %v297_v60 = vmul.f32 %v396_v18, %v396_v18 }
  0xe4   :  { %v183_v19 = vpop.f32.mrf.mxu0  ;;  %v215_v20 = vpop.f32.mrf.mxu1 }
  0xe5   :  { %246 = vst [vmem:[%s579_s2] sm:$0xff] %v183_v19  ;;  %254 = vst [vmem:[%s579_s2 + $0x40] sm:$0xff] %v215_v20  ;;  %v287_v25 = vmul.f32 %v183_v19, %v183_v19  ;;  %v295_v54 = vmul.f32 %v215_v20, %v215_v20 }
  0xe6   :  { %v389_v21 = vpop.f32.mrf.mxu0  ;;  %v397_v22 = vpop.f32.mrf.mxu1 }
  0xe7   :  { %249 = vst [vmem:[%s579_s2 + $0x18] sm:$0xff] %v389_v21  ;;  %257 = vst [vmem:[%s579_s2 + $0x58] sm:$0xff] %v397_v22  ;;  %v290_v35 = vmul.f32 %v389_v21, %v389_v21  ;;  %v298_v63 = vmul.f32 %v397_v22, %v397_v22 }
  0xe8   :  { %v186_v23 = vpop.f32.mrf.mxu0  ;;  %v218_v24 = vpop.f32.mrf.mxu1 }
  0xe9   :  { %247 = vst [vmem:[%s579_s2 + $0x8] sm:$0xff] %v186_v23  ;;  %v263_v26 = vadd.f32 %v186_v23, %v183_v19  ;;  %v288_v27 = vmul.f32 %v186_v23, %v186_v23  ;;  %255 = vst [vmem:[%s579_s2 + $0x48] sm:$0xff] %v218_v24  ;;  %v296_v58 = vmul.f32 %v218_v24, %v218_v24 }
  0xea   :  { %v392_v28 = vpop.f32.mrf.mxu0  ;;  %v400_v29 = vpop.f32.mrf.mxu1 }
  0xeb   :  { %v264_v31 = vadd.f32 %v388_v17, %v263_v26  ;;  %v303_v32 = vadd.f32 %v288_v27, %v287_v25  ;;  %252 = vst [vmem:[%s579_s2 + $0x30] sm:$0xff] %v392_v28  ;;  %260 = vst [vmem:[%s579_s2 + $0x70] sm:$0xff] %v400_v29  ;;  %v293_v48 = vmul.f32 %v392_v28, %v392_v28  ;;  %v286_v27 = vld [vmem:[%s578_s4] sm:$0x1] }
  0xec   :  { %v199_v33 = vpop.f32.mrf.mxu0  ;;  %v231_v34 = vpop.f32.mrf.mxu1  ;;  %v301_v8 = vmul.f32 %v400_v29, %v400_v29 }
  0xed   :  { %v304_v36 = vadd.f32 %v303_v32, %v289_v30  ;;  %250 = vst [vmem:[%s579_s2 + $0x20] sm:$0xff] %v199_v33  ;;  %v265_v37 = vadd.f32 %v389_v21, %v264_v31  ;;  %258 = vst [vmem:[%s579_s2 + $0x60] sm:$0xff] %v231_v34  ;;  %v291_v41 = vmul.f32 %v199_v33, %v199_v33 }
  0xee   :  { %v393_v38 = vpop.f32.mrf.mxu0  ;;  %v401_v39 = vpop.f32.mrf.mxu1  ;;  %v299_v3 = vmul.f32 %v231_v34, %v231_v34 }
  0xef   :  { %v266_v40 = vadd.f32 %v265_v37, %v199_v33  ;;  %v305_v42 = vadd.f32 %v304_v36, %v290_v35  ;;  %253 = vst [vmem:[%s579_s2 + $0x38] sm:$0xff] %v393_v38  ;;  %261 = vst [vmem:[%s579_s2 + $0x78] sm:$0xff] %v401_v39  ;;  %v294_v51 = vmul.f32 %v393_v38, %v393_v38 }
  0xf0   :  { %v202_v43 = vpop.f32.mrf.mxu0  ;;  %v234_v44 = vpop.f32.mrf.mxu1  ;;  %v302_v11 = vmul.f32 %v401_v39, %v401_v39 }
  0xf1   :  { %v306_v45 = vadd.f32 %v305_v42, %v291_v41  ;;  %251 = vst [vmem:[%s579_s2 + $0x28] sm:$0xff] %v202_v43  ;;  %v267_v46 = vadd.f32 %v266_v40, %v202_v43  ;;  %v292_v47 = vmul.f32 %v202_v43, %v202_v43  ;;  %259 = vst [vmem:[%s579_s2 + $0x68] sm:$0xff] %v234_v44 }
  0xf2   :  { %v300_v7 = vmul.f32 %v234_v44, %v234_v44 }
  0xf3   :  { %v268_v49 = vadd.f32 %v392_v28, %v267_v46  ;;  %v307_v50 = vadd.f32 %v306_v45, %v292_v47 }
  0xf5   :  { %v269_v52 = vadd.f32 %v393_v38, %v268_v49  ;;  %v308_v53 = vadd.f32 %v307_v50, %v293_v48 }
  0xf7   :  { %v309_v55 = vadd.f32 %v308_v53, %v294_v51  ;;  %v270_v56 = vadd.f32 %v269_v52, %v215_v20 }
  0xf9   :  { %v271_v57 = vadd.f32 %v270_v56, %v218_v24  ;;  %v310_v59 = vadd.f32 %v309_v55, %v295_v54  ;;  %v262_v24 = vld [vmem:[%s577_s3] sm:$0x1] }
  0xfb   :  { %v272_v61 = vadd.f32 %v396_v18, %v271_v57  ;;  %v311_v62 = vadd.f32 %v310_v59, %v296_v58 }
  0xfd   :  { %v312_v0 = vadd.f32 %v311_v62, %v297_v60  ;;  %v273_v1 = vadd.f32 %v397_v22, %v272_v61 }
  0xff   :  { %v274_v2 = vadd.f32 %v273_v1, %v231_v34  ;;  %v313_v4 = vadd.f32 %v312_v0, %v298_v63 }
 0x101   :  { %v314_v5 = vadd.f32 %v313_v4, %v299_v3  ;;  %v275_v6 = vadd.f32 %v274_v2, %v234_v44 }
 0x103   :  { %v276_v9 = vadd.f32 %v400_v29, %v275_v6  ;;  %v315_v10 = vadd.f32 %v314_v5, %v300_v7 }
 0x105   :  { %v277_v12 = vadd.f32 %v401_v39, %v276_v9  ;;  %v316_v13 = vadd.f32 %v315_v10, %v301_v8 }
 0x107   :  { %v278_v14 = vrot.slane %v277_v12, 4  ;;  %v317_v15 = vadd.f32 %v316_v13, %v302_v11 }
 0x109   :  { %v279_v16 = vadd.f32 %v278_v14, %v277_v12  ;;  %v318_v17 = vrot.slane %v317_v15, 4 }
 0x10b   :  { %v280_v18 = vrot.slane %v279_v16, 2  ;;  %v319_v19 = vadd.f32 %v318_v17, %v317_v15 }
 0x10d   :  { %v281_v20 = vadd.f32 %v280_v18, %v279_v16  ;;  %v320_v21 = vrot.slane %v319_v19, 2 }
 0x10f   :  { %v282_v22 = vrot.slane %v281_v20, 1  ;;  %v321_v23 = vadd.f32 %v320_v21, %v319_v19 }
 0x111   :  { %v283_v25 = vadd.f32 %v282_v22, %v281_v20  ;;  %v322_v26 = vrot.slane %v321_v23, 1 }
 0x113   :  { %v284_v28 = vadd.f32 %v283_v25, %v262_v24  ;;  %v323_v29 = vadd.f32 %v322_v26, %v321_v23 }
 0x115   :  { %285 = vst [vmem:[%s577_s3] sm:$0x1] %v284_v28  ;;  %v324_v30 = vadd.f32 %v323_v29, %v286_v27 }
 0x117   :  { %325 = vst [vmem:[%s578_s4] sm:$0x1] %v324_v30 }

</bundles_post_ra>
